<compile_context>
chip_gen: v6e
topology: v6e:2x2x1
jax: 0.10.0
libtpu: 0.0.40
codegen_flags: <defaults>
</compile_context>

<pallas_src>
import functools

import jax
import jax.numpy as jnp
from jax.experimental import pallas as pl
from jax.experimental.pallas import tpu as pltpu


def _round_up(x: int, m: int) -> int:
    return ((x + m - 1) // m) * m


def _bf16_eup_supported() -> bool:
    """bf16 VPU/EUP path exists on v6e/v7x; not on v2-v5."""
    try:
        kind = jax.devices()[0].device_kind.lower()
    except Exception:
        return False
    if "tpu" not in kind:
        return False
    return not any(old in kind for old in ("v2", "v3", "v4", "v5"))


def _head_kernel(x_ref, w1_ref, b1_ref, w2_ref, b2_ref, out_ref, *, bf16_eup):
    # x_ref: [B_tile, H_pad] bf16 CLS rows (sliced/padded/cast in the wrapper).
    # dropout (eval mode) -> identity.
    x = x_ref[...]
    # dense: bf16 operands on the MXU, f32 accumulation; bias add in f32.
    h = jnp.dot(x, w1_ref[...], preferred_element_type=jnp.float32)
    h = h + b1_ref[...]
    if bf16_eup:
        # v6e/v7x: bf16 EUP roughly halves tanh cycles; the second matmul
        # consumes bf16 anyway, so accuracy is unchanged.
        h = jnp.tanh(h.astype(jnp.bfloat16))
    else:
        # v5e and older: no bf16 VPU/EUP path -> tanh in f32, cast afterwards.
        h = jnp.tanh(h).astype(jnp.bfloat16)
    # dropout (eval mode) -> identity.
    # out_proj, padded to 128 output lanes (column 0 is the real logit).
    out_ref[...] = (
        jnp.dot(h, w2_ref[...], preferred_element_type=jnp.float32) + b2_ref[...]
    )
    # TODO(synk): training-mode dropout (pltpu.prng_seed / prng_random_bits) is
    # not implemented; eval semantics only.


@functools.partial(jax.jit, static_argnames=("b_tile_max",))
def roberta_classification_head(features, w1, b1, w2, b2, *, b_tile_max=1024):
    """features: [B, S, H] f32; w1: [H, H] ([in, out]); b1: [H]; w2: [H, 1]; b2: [1]."""
    B, S, H = features.shape
    assert w1.shape == (H, H), f"w1 must be [in, out] = [H, H], got {w1.shape}"
    assert b1.shape == (H,), b1.shape
    assert w2.size == H, f"w2 must be [in, out] = [H, 1], got {w2.shape}"
    assert b2.size == 1, b2.shape

    H_pad = _round_up(max(H, 1), 128)
    N_pad = 128                                   # lane-dense output width

    # Batch tiling: 16-row granularity (bf16 sublane tile). Produce >= 2 grid
    # steps when the batch allows it (keeps v7x's second TensorCore busy) but
    # cap at b_tile_max so big batches still use tall, MXU-friendly tiles.
    B_pad0 = _round_up(max(B, 1), 16)
    B_tile = min(b_tile_max, max(16, _round_up(pl.cdiv(B_pad0, 2), 16)))
    B_pad = _round_up(B_pad0, B_tile)

    # Only the CLS token enters the kernel: slice + (optional) pad + bf16 cast
    # fuse into one producer fusion under jit.
    cls = features[:, 0, :].astype(jnp.bfloat16)
    if (B_pad, H_pad) != (B, H):
        cls = jnp.pad(cls, ((0, B_pad - B), (0, H_pad - H)))

    # Weights in bf16 (halves DMA, doubles MXU rate); biases stay f32.
    w1p = w1.astype(jnp.bfloat16)
    b1p = b1.reshape(1, H).astype(jnp.float32)
    if H_pad != H:
        w1p = jnp.pad(w1p, ((0, H_pad - H), (0, H_pad - H)))
        b1p = jnp.pad(b1p, ((0, 0), (0, H_pad - H)))
    w2p = jnp.pad(w2.reshape(H, 1).astype(jnp.bfloat16),
                  ((0, H_pad - H), (0, N_pad - 1)))
    b2p = jnp.pad(b2.reshape(1, 1).astype(jnp.float32), ((0, 0), (0, N_pad - 1)))

    # Constant-index weight/bias blocks never change across grid steps ->
    # single-buffer them (default double buffering wastes VMEM, esp. on v7x).
    wgt_mode = pl.Buffered(1)

    # Derive the VMEM limit from the actual block sizes (don't hard-code).
    vmem_needed = (
        2 * B_tile * H_pad * 2        # x tile: bf16, double-buffered
        + H_pad * H_pad * 2           # w1: bf16, single-buffered
        + H_pad * 4                   # b1: f32
        + H_pad * N_pad * 2           # w2: bf16
        + N_pad * 4                   # b2: f32
        + 2 * B_tile * N_pad * 4      # out tile: f32, double-buffered
    )
    vmem_limit = min(128 * 1024 * 1024,
                     max(16 * 1024 * 1024, int(vmem_needed * 1.25) + (2 << 20)))
    # TODO(synk): for very large hidden sizes (H_pad >= ~4096) a fully-resident
    # w1 no longer fits v7x's 64 MiB VMEM -- split K over an "arbitrary" grid
    # axis with an f32 accumulator instead of keeping w1 resident.

    kernel = functools.partial(_head_kernel, bf16_eup=_bf16_eup_supported())

    grid = (B_pad // B_tile,)
    out = pl.pallas_call(
        kernel,
        out_shape=jax.ShapeDtypeStruct((B_pad, N_pad), jnp.float32),
        grid_spec=pltpu.PrefetchScalarGridSpec(
            num_scalar_prefetch=0,
            grid=grid,
            in_specs=[
                pl.BlockSpec((B_tile, H_pad), lambda i: (i, 0)),   # CLS activations
                pl.BlockSpec((H_pad, H_pad), lambda i: (0, 0),
                             pipeline_mode=wgt_mode),              # w1 (resident)
                pl.BlockSpec((1, H_pad), lambda i: (0, 0),
                             pipeline_mode=wgt_mode),              # b1 (resident)
                pl.BlockSpec((H_pad, N_pad), lambda i: (0, 0),
                             pipeline_mode=wgt_mode),              # w2 (resident)
                pl.BlockSpec((1, N_pad), lambda i: (0, 0),
                             pipeline_mode=wgt_mode),              # b2 (resident)
            ],
            out_specs=pl.BlockSpec((B_tile, N_pad), lambda i: (i, 0)),
        ),
        compiler_params=pltpu.CompilerParams(
            dimension_semantics=("parallel",),     # batch tiles split across TCs
            vmem_limit_bytes=vmem_limit,
        ),
    )(cls, w1p, b1p, w2p, b2p)

    return out[:B, 0:1]


def _reference(features, w1, b1, w2, b2):
    x = features[:, 0, :]
    h = jnp.tanh(x @ w1 + b1)
    return h @ w2 + b2


if __name__ == "__main__":
    B, S, H = 2, 8, 32  # small shapes consistent with the module's forward

    key = jax.random.PRNGKey(0)
    k_feat, k_w1, k_b1, k_w2, k_b2 = jax.random.split(key, 5)

    features = jax.random.normal(k_feat, (B, S, H), dtype=jnp.float32)
    # dense: Linear(H, H) -> weight stored as [in, out], bias [H]
    w1 = jax.random.normal(k_w1, (H, H), dtype=jnp.float32) * 0.02
    b1 = jax.random.normal(k_b1, (H,), dtype=jnp.float32) * 0.02
    # out_proj: Linear(H, 1) -> weight [in, out] = [H, 1], bias [1]
    w2 = jax.random.normal(k_w2, (H, 1), dtype=jnp.float32) * 0.02
    b2 = jax.random.normal(k_b2, (1,), dtype=jnp.float32) * 0.02

    out = roberta_classification_head(features, w1, b1, w2, b2)
    out = jax.block_until_ready(out)

    ref = _reference(features, w1, b1, w2, b2)
    assert out.shape == (B, 1), out.shape
    # bf16 MXU operands with f32 accumulation -> loose-but-tight-enough tolerance
    assert jnp.allclose(out, ref, atol=1e-2, rtol=1e-2), (out, ref)

    print("KERNEL_OK")
</pallas_src>

<mosaic_0001>
module attributes {stable_mosaic.version = 11 : i64} {
  func.func @_head_kernel(%arg0: i32, %arg1: memref<16x128xbf16, #tpu.memory_space<vmem>>, %arg2: memref<128x128xbf16, #tpu.memory_space<vmem>>, %arg3: memref<1x128xf32, #tpu.memory_space<vmem>>, %arg4: memref<128x128xbf16, #tpu.memory_space<vmem>>, %arg5: memref<1x128xf32, #tpu.memory_space<vmem>>, %arg6: memref<16x128xf32, #tpu.memory_space<vmem>>) attributes {dimension_semantics = [#tpu.dimension_semantics<parallel>], iteration_bounds = array<i64: 1>, scalar_prefetch = 0 : i64, scratch_operands = 0 : i64, tpu.core_type = #tpu.core_type<tc>, window_params = [{transform_indices = @transform_0, window_bounds = array<i64: 16, 128>}, {pipeline_mode = #tpu.pipeline_mode<synchronous>, transform_indices = @transform_1, window_bounds = array<i64: 128, 128>}, {pipeline_mode = #tpu.pipeline_mode<synchronous>, transform_indices = @transform_2, window_bounds = array<i64: 1, 128>}, {pipeline_mode = #tpu.pipeline_mode<synchronous>, transform_indices = @transform_3, window_bounds = array<i64: 128, 128>}, {pipeline_mode = #tpu.pipeline_mode<synchronous>, transform_indices = @transform_4, window_bounds = array<i64: 1, 128>}, {transform_indices = @transform_5, window_bounds = array<i64: 16, 128>}]} {
    %c0 = arith.constant 0 : index
    %c0_0 = arith.constant 0 : index
    %0 = vector.load %arg1[%c0, %c0_0] : memref<16x128xbf16, #tpu.memory_space<vmem>>, vector<16x128xbf16>
    %c0_1 = arith.constant 0 : index
    %c0_2 = arith.constant 0 : index
    %1 = vector.load %arg2[%c0_1, %c0_2] : memref<128x128xbf16, #tpu.memory_space<vmem>>, vector<128x128xbf16>
    %cst = arith.constant dense<0.000000e+00> : vector<16x128xf32>
    %2 = tpu.matmul %0, %1, %cst {dimension_numbers = #tpu.dot_dimension_numbers<[1], [0], [0], [1], [0, 0, 1, 1], [], []>} : vector<16x128xbf16>, vector<128x128xbf16>, vector<16x128xf32> -> vector<16x128xf32>
    %c0_3 = arith.constant 0 : index
    %c0_4 = arith.constant 0 : index
    %3 = vector.load %arg3[%c0_3, %c0_4] : memref<1x128xf32, #tpu.memory_space<vmem>>, vector<1x128xf32>
    %4 = vector.broadcast %3 : vector<1x128xf32> to vector<16x128xf32>
    %5 = arith.addf %2, %4 : vector<16x128xf32>
    %6 = math.tanh %5 : vector<16x128xf32>
    %7 = arith.truncf %6 : vector<16x128xf32> to vector<16x128xbf16>
    %c0_5 = arith.constant 0 : index
    %c0_6 = arith.constant 0 : index
    %8 = vector.load %arg4[%c0_5, %c0_6] : memref<128x128xbf16, #tpu.memory_space<vmem>>, vector<128x128xbf16>
    %cst_7 = arith.constant dense<0.000000e+00> : vector<16x128xf32>
    %9 = tpu.matmul %7, %8, %cst_7 {dimension_numbers = #tpu.dot_dimension_numbers<[1], [0], [0], [1], [0, 0, 1, 1], [], []>} : vector<16x128xbf16>, vector<128x128xbf16>, vector<16x128xf32> -> vector<16x128xf32>
    %c0_8 = arith.constant 0 : index
    %c0_9 = arith.constant 0 : index
    %10 = vector.load %arg5[%c0_8, %c0_9] : memref<1x128xf32, #tpu.memory_space<vmem>>, vector<1x128xf32>
    %11 = vector.broadcast %10 : vector<1x128xf32> to vector<16x128xf32>
    %12 = arith.addf %9, %11 : vector<16x128xf32>
    %c0_10 = arith.constant 0 : index
    %c0_11 = arith.constant 0 : index
    %13 = vector.load %arg6[%c0_10, %c0_11] : memref<16x128xf32, #tpu.memory_space<vmem>>, vector<16x128xf32>
    tpu.vector_store %arg6[%c0_10, %c0_11], %12 {strides = array<i32>} : memref<16x128xf32, #tpu.memory_space<vmem>>, vector<16x128xf32>,
    return
  }
  func.func @transform_0(%arg0: i32) -> (i32, i32) {
    %c0_i32 = arith.constant 0 : i32
    %c0_i32_0 = arith.constant 0 : i32
    return %arg0, %c0_i32 : i32, i32
  }
  func.func @transform_1(%arg0: i32) -> (i32, i32) {
    %c0_i32 = arith.constant 0 : i32
    %c0_i32_0 = arith.constant 0 : i32
    %c0_i32_1 = arith.constant 0 : i32
    return %c0_i32, %c0_i32_0 : i32, i32
  }
  func.func @transform_2(%arg0: i32) -> (i32, i32) {
    %c0_i32 = arith.constant 0 : i32
    %c0_i32_0 = arith.constant 0 : i32
    %c0_i32_1 = arith.constant 0 : i32
    return %c0_i32, %c0_i32_0 : i32, i32
  }
  func.func @transform_3(%arg0: i32) -> (i32, i32) {
    %c0_i32 = arith.constant 0 : i32
    %c0_i32_0 = arith.constant 0 : i32
    %c0_i32_1 = arith.constant 0 : i32
    return %c0_i32, %c0_i32_0 : i32, i32
  }
  func.func @transform_4(%arg0: i32) -> (i32, i32) {
    %c0_i32 = arith.constant 0 : i32
    %c0_i32_0 = arith.constant 0 : i32
    %c0_i32_1 = arith.constant 0 : i32
    return %c0_i32, %c0_i32_0 : i32, i32
  }
  func.func @transform_5(%arg0: i32) -> (i32, i32) {
    %c0_i32 = arith.constant 0 : i32
    %c0_i32_0 = arith.constant 0 : i32
    return %arg0, %c0_i32 : i32, i32
  }
}

</mosaic_0001>

<bundles_post_ra>
// kernel: roberta_classification_head.1
= control target key start
LH: loop header
LB: loop body
LE: loop exit
PB: predicated region body
PF: predicated region fallthrough
CT: control target
= control target key end

     0   :  { %v362_v0 = vmov 0.0   ;;  %vm363_vm0 = vmmov 0   ;;  %s457_s1 = inlined_call_operand.vmem [shape: bf16[128,128], index: 1, kind: input, shape index: {}]   ;;  %s458_s3 = inlined_call_operand.vmem [shape: bf16[128,128], index: 3, kind: input, shape index: {}]   ;;  %s459_s0 = inlined_call_operand.vmem [shape: bf16[16,128], index: 0, kind: input, shape index: {}]   ;;  %s460_s2 = inlined_call_operand.vmem [shape: f32[1,128], index: 2, kind: input, shape index: {}]   ;;  %s461_s4 = inlined_call_operand.vmem [shape: f32[1,128], index: 4, kind: input, shape index: {}]   ;;  %s462_s5 = inlined_call_operand.vmem [shape: f32[16,128], index: 5, kind: output, shape index: {}]  }
   0x1   :  { %299 = vmatprep.subr.bf16.mxu0 %v362_v0  ;;  %v341_v1 = vld [vmem:[%s457_s1 + $0x38] sm:$0xff]   ;;  %315 = vmatprep.mubr.msk.bf16.mxu0 %vm363_vm0, %v362_v0  ;;  %v342_v2 = vld [vmem:[%s457_s1 + $0x30] sm:$0xff]   ;;  %v343_v3 = vld [vmem:[%s457_s1 + $0x28] sm:$0xff]  }
   0x2   :  { %319 = vmatprep.subr.bf16.mxu1 %v362_v0  ;;  %335 = vmatprep.mubr.msk.bf16.mxu1 %vm363_vm0, %v362_v0  ;;  %v350_v4 = vld [vmem:[%s458_s3 + $0x38] sm:$0xff]   ;;  %v344_v5 = vld [vmem:[%s457_s1 + $0x20] sm:$0xff]   ;;  %v351_v6 = vld [vmem:[%s458_s3 + $0x30] sm:$0xff]  }
   0x3   :  { %300 = vmatpush3.bf16.msra.mxu0 %v341_v1  ;;  %320 = vmatpush3.bf16.msra.mxu1 %v350_v4  ;;  %v345_v7 = vld [vmem:[%s457_s1 + $0x18] sm:$0xff]   ;;  %v346_v8 = vld [vmem:[%s457_s1 + $0x10] sm:$0xff]   ;;  %v347_v9 = vld [vmem:[%s457_s1 + $0x8] sm:$0xff]  }
   0x4   :  { %301 = vmatprep.subr.bf16.mxu0 %v362_v0  ;;  %321 = vmatprep.subr.bf16.mxu1 %v362_v0  ;;  %v348_v10 = vld [vmem:[%s457_s1] sm:$0xff]   ;;  %v352_v12 = vld [vmem:[%s458_s3 + $0x28] sm:$0xff]   ;;  %v354_v14 = vld [vmem:[%s458_s3 + $0x18] sm:$0xff]  }
   0x5   :  { %v349_v11 = vld [vmem:[%s459_s0] sm:$0xff]   ;;  %v355_v15 = vld [vmem:[%s458_s3 + $0x10] sm:$0xff]   ;;  %v356_v16 = vld [vmem:[%s458_s3 + $0x8] sm:$0xff]  }
   0x6   :  { %v353_v13 = vld [vmem:[%s458_s3 + $0x20] sm:$0xff]  }
   0x7   :  { %302 = vmatpush3.bf16.msra.mxu0 %v342_v2  ;;  %322 = vmatpush3.bf16.msra.mxu1 %v351_v6  ;;  %v357_v17 = vld [vmem:[%s458_s3] sm:$0xff]  }
   0x8   :  { %303 = vmatprep.subr.bf16.mxu0 %v362_v0  ;;  %323 = vmatprep.subr.bf16.mxu1 %v362_v0  ;;  %v262_v18 = vld [vmem:[%s460_s2] ss:$0 sm:$0xff] }
   0x9   :  { %v272_v28 = vld [vmem:[%s461_s4] ss:$0 sm:$0xff] }
   0xb   :  { %304 = vmatpush3.bf16.msra.mxu0 %v343_v3  ;;  %324 = vmatpush3.bf16.msra.mxu1 %v352_v12 }
   0xc   :  { %305 = vmatprep.subr.bf16.mxu0 %v362_v0  ;;  %325 = vmatprep.subr.bf16.mxu1 %v362_v0 }
   0xf   :  { %306 = vmatpush3.bf16.msra.mxu0 %v344_v5  ;;  %326 = vmatpush3.bf16.msra.mxu1 %v353_v13 }
  0x10   :  { %307 = vmatprep.subr.bf16.mxu0 %v362_v0  ;;  %327 = vmatprep.subr.bf16.mxu1 %v362_v0 }
  0x13   :  { %308 = vmatpush3.bf16.msra.mxu0 %v345_v7  ;;  %328 = vmatpush3.bf16.msra.mxu1 %v354_v14 }
  0x14   :  { %309 = vmatprep.subr.bf16.mxu0 %v362_v0  ;;  %329 = vmatprep.subr.bf16.mxu1 %v362_v0 }
  0x17   :  { %310 = vmatpush3.bf16.msra.mxu0 %v346_v8  ;;  %330 = vmatpush3.bf16.msra.mxu1 %v355_v15 }
  0x18   :  { %311 = vmatprep.subr.bf16.mxu0 %v362_v0  ;;  %331 = vmatprep.subr.bf16.mxu1 %v362_v0 }
  0x1b   :  { %312 = vmatpush3.bf16.msra.mxu0 %v347_v9  ;;  %332 = vmatpush3.bf16.msra.mxu1 %v356_v16 }
  0x1c   :  { %313 = vmatprep.subr.bf16.mxu0 %v362_v0  ;;  %333 = vmatprep.subr.bf16.mxu1 %v362_v0 }
  0x1f   :  { %314 = vmatpush3.bf16.msra.mxu0 %v348_v10  ;;  %334 = vmatpush3.bf16.msra.mxu1 %v357_v17 }
  0x22   :  { %316 = vmatmul.mubr.bf16.vlgmr.msra.gmra.mxu0 %v349_v11 }
  0xe2   :  { %v134_v19 = vpop.f32.mrf.mxu0 }
  0xe3   :  { %v135_v20 = vadd.f32 %v262_v18, %v134_v19 }
  0xe4   :  { %v317_v21 = vpop.f32.mrf.mxu0 }
  0xe5   :  { %358 = vtanh.f32 %v135_v20 }
  0xe6   :  { %v137_v22 = vpop.f32.mrf.mxu0 }
  0xe7   :  { %v138_v23 = vadd.f32 %v262_v18, %v137_v22 }
  0xe8   :  { %v318_v24 = vpop.f32.mrf.mxu0 }
  0xe9   :  { %360 = vtanh.f32 %v138_v23 }
  0xf2   :  { %v359_v25 = vpop.eup %358 }
  0xf6   :  { %v361_v26 = vpop.eup %360 }
  0xf7   :  { %v143_v27 = vpack.c.bf16 %v361_v26, %v359_v25 }
  0xf9   :  { %336 = vmatmul.mubr.bf16.vlgmr.msra.gmra.mxu1 %v143_v27 }
 0x1b9   :  { %v249_v29 = vpop.f32.mrf.mxu1 }
 0x1ba   :  { %v250_v30 = vadd.f32 %v272_v28, %v249_v29 }
 0x1bb   :  { %v337_v31 = vpop.f32.mrf.mxu1 }
 0x1bc   :  { %256 = vst [vmem:[%s462_s5] sm:$0xff] %v250_v30 }
 0x1bd   :  { %v252_v32 = vpop.f32.mrf.mxu1 }
 0x1be   :  { %v253_v33 = vadd.f32 %v272_v28, %v252_v32 }
 0x1bf   :  { %v338_v34 = vpop.f32.mrf.mxu1 }
 0x1c0   :  { %257 = vst [vmem:[%s462_s5 + $0x8] sm:$0xff] %v253_v33 }

</bundles_post_ra>
